<compile_context>
chip_gen: v7x
topology: tpu7x:2x2x1
jax: 0.10.0
libtpu: 0.0.40
codegen_flags: <defaults>
</compile_context>

<pallas_src>
import jax
import jax.numpy as jnp
from jax.experimental import pallas as pl
from jax.experimental.pallas import tpu as pltpu


def _round_up(x, m):
    return ((x + m - 1) // m) * m


def _sublane_mult(itemsize):
    # keep the second-minor block dim a native-tiling multiple per dtype
    return 8 if itemsize >= 4 else (16 if itemsize == 2 else 32)


def _pick_tb(batch, row_bytes, itemsize, budget_bytes=8 * 1024 * 1024):
    """Batch-tile size: big enough to pipeline, small enough for VMEM.

    Keeps the double-buffered input block within ~budget_bytes, which is safe
    on v5e's 16 MiB default scoped VMEM and v7x's 64 MiB physical VMEM.
    """
    mult = _sublane_mult(itemsize)
    tb = budget_bytes // max(1, 2 * row_bytes)
    tb = max(mult, min(1024, (tb // mult) * mult))
    return min(tb, _round_up(batch, mult))


def _clamp_tb(tb, batch, itemsize):
    mult = _sublane_mult(itemsize)
    return min(_round_up(tb, mult), _round_up(batch, mult))


def _softmax_weighted_sum(logits, out_ref):
    """out_ref[...] = sum(centered * softmax(centered), -1, keepdims=True)."""
    length = logits.shape[-1]
    mx = jnp.max(logits, axis=-1, keepdims=True)            # XLU reduce
    mean = jnp.sum(logits, axis=-1, keepdims=True) * (1.0 / length)
    e = jnp.exp(logits - mx)                                 # EUP
    s1 = jnp.sum(e, axis=-1, keepdims=True)
    s2 = jnp.sum(logits * e, axis=-1, keepdims=True)
    # s1 is only (TB, 1), so an exact reciprocal is negligible and keeps the
    # 1e-5 reference tolerance (approx=True would add ~2^-14 relative error).
    out_ref[...] = (s2 * pl.reciprocal(s1, approx=False) - mean).astype(
        out_ref.dtype)


# ----------------------------------------------------------------------------
# Path 1: generic transform over logits from any model.
# ----------------------------------------------------------------------------
def _profile_transform_kernel(logits_ref, out_ref):
    # logits may be bf16 in HBM (half the DMA bytes); upcast in VMEM.
    _softmax_weighted_sum(logits_ref[...].astype(jnp.float32), out_ref)


def profile_wrapper_transform(logits, *, tb=None):
    """Pallas implementation of ProfileWrapper's post-model math."""
    B, L = logits.shape
    itemsize = jnp.dtype(logits.dtype).itemsize
    tb = _pick_tb(B, L * itemsize, itemsize) if tb is None else _clamp_tb(
        tb, B, itemsize)
    return pl.pallas_call(
        _profile_transform_kernel,
        out_shape=jax.ShapeDtypeStruct((B, 1), jnp.float32),
        grid=(pl.cdiv(B, tb),),
        in_specs=[pl.BlockSpec((tb, L), lambda i: (i, 0))],
        out_specs=pl.BlockSpec((tb, 1), lambda i: (i, 0)),
        compiler_params=pltpu.CompilerParams(
            dimension_semantics=("parallel",),   # batch tiles are independent
            vmem_limit_bytes=32 * 1024 * 1024,
        ),
    )(logits)


# ----------------------------------------------------------------------------
# Path 2: fuse the synthetic linear "model" into the kernel so the (B, L)
# logits tensor never round-trips HBM.
# ----------------------------------------------------------------------------
# TODO(synk): the wrapped `model` in dragonnfruit is an arbitrary external
# network; this linear stand-in exists only to produce logits. The generic
# transform kernel above is the part that maps to ProfileWrapper itself.
def synthetic_model(X, cell_states, w_x, w_cell):
    """Produces 'logits' (B, L) from X (B, C, L) and cell_states (B, H)."""
    return jnp.einsum("bcl,c->bl", X, w_x) + (cell_states @ w_cell)[:, None]


def _fused_forward_kernel(x_ref, bias_ref, w_ref, out_ref):
    # x_ref: (TB, C, L) VMEM; bias_ref: (TB, 1) VMEM; w_ref: (C,) f32 SMEM.
    tb, num_c, length = x_ref.shape
    acc = jnp.zeros((tb, length), jnp.float32)
    for c in range(num_c):                 # C is tiny & static -> unrolled
        acc = acc + x_ref[:, c, :].astype(jnp.float32) * w_ref[c]
    logits = acc + bias_ref[...].astype(jnp.float32)
    _softmax_weighted_sum(logits, out_ref)


def profile_wrapper_forward_fused(X, cell_states, w_x, w_cell, *, tb=None):
    B, C, L = X.shape
    itemsize = jnp.dtype(X.dtype).itemsize
    tb = _pick_tb(B, C * L * itemsize, itemsize) if tb is None else _clamp_tb(
        tb, B, itemsize)
    bias = (cell_states @ w_cell)[:, None].astype(jnp.float32)   # (B,1), tiny
    return pl.pallas_call(
        _fused_forward_kernel,
        out_shape=jax.ShapeDtypeStruct((B, 1), jnp.float32),
        grid=(pl.cdiv(B, tb),),
        in_specs=[
            pl.BlockSpec((tb, C, L), lambda i: (i, 0, 0)),
            pl.BlockSpec((tb, 1), lambda i: (i, 0)),
            pl.BlockSpec(memory_space=pltpu.MemorySpace.SMEM),   # w_x scalars
        ],
        out_specs=pl.BlockSpec((tb, 1), lambda i: (i, 0)),
        compiler_params=pltpu.CompilerParams(
            dimension_semantics=("parallel",),
            vmem_limit_bytes=32 * 1024 * 1024,
        ),
    )(X, bias, w_x.astype(jnp.float32))


def profile_wrapper_forward(X, cell_states, w_x, w_cell, *, tb=None):
    """model (XLA glue) + Pallas transform kernel."""
    logits = synthetic_model(X, cell_states, w_x, w_cell)
    return profile_wrapper_transform(logits, tb=tb)


if __name__ == "__main__":
    B, C, L, H = 32, 4, 128, 8  # batch, channels, sequence length, cell dim

    key = jax.random.PRNGKey(0)
    kx, kc, kwx, kwc = jax.random.split(key, 4)
    X = jax.random.normal(kx, (B, C, L), dtype=jnp.float32)
    cell_states = jax.random.normal(kc, (B, H), dtype=jnp.float32)
    w_x = jax.random.normal(kwx, (C,), dtype=jnp.float32) * 0.1
    w_cell = jax.random.normal(kwc, (H,), dtype=jnp.float32) * 0.1

    # pure-JAX reference mirroring the PyTorch forward exactly
    logits = synthetic_model(X, cell_states, w_x, w_cell)
    centered = logits - jnp.mean(logits, axis=-1, keepdims=True)
    y = jnp.exp(
        centered - jax.scipy.special.logsumexp(centered, axis=-1, keepdims=True)
    )
    ref = jnp.sum(centered * y, axis=-1, keepdims=True)

    # 1) generic transform kernel (tb=16 -> 2-step batch grid at this size)
    out = profile_wrapper_forward(X, cell_states, w_x, w_cell, tb=16)
    out = jax.block_until_ready(out)
    assert out.shape == (B, 1)
    assert jnp.allclose(out, ref, atol=1e-5, rtol=1e-5)

    # 2) bf16 logits straight into the kernel (half HBM bytes, upcast in VMEM)
    out_bf16 = profile_wrapper_transform(logits.astype(jnp.bfloat16), tb=16)
    out_bf16 = jax.block_until_ready(out_bf16)
    assert jnp.allclose(out_bf16, ref, atol=3e-2, rtol=3e-2)

    # 3) fused forward: logits never materialized in HBM
    out_fused = profile_wrapper_forward_fused(X, cell_states, w_x, w_cell, tb=16)
    out_fused = jax.block_until_ready(out_fused)
    assert out_fused.shape == (B, 1)
    assert jnp.allclose(out_fused, ref, atol=1e-5, rtol=1e-5)

    print("KERNEL_OK")
</pallas_src>

<mosaic_0001>
module attributes {stable_mosaic.version = 11 : i64} {
  func.func @_profile_transform_kernel(%arg0: i32, %arg1: memref<16x128xf32, #tpu.memory_space<vmem>>, %arg2: memref<16x1xf32, #tpu.memory_space<vmem>>) attributes {dimension_semantics = [#tpu.dimension_semantics<parallel>], iteration_bounds = array<i64: 2>, scalar_prefetch = 0 : i64, scratch_operands = 0 : i64, tpu.core_type = #tpu.core_type<tc>, window_params = [{transform_indices = @transform_0, window_bounds = array<i64: 16, 128>}, {transform_indices = @transform_1, window_bounds = array<i64: 16, 1>}]} {
    %c0 = arith.constant 0 : index
    %c0_0 = arith.constant 0 : index
    %0 = vector.load %arg1[%c0, %c0_0] : memref<16x128xf32, #tpu.memory_space<vmem>>, vector<16x128xf32>
    %cst = arith.constant dense<0xFF800000> : vector<16xf32>
    %1 = vector.multi_reduction <maximumf>, %0, %cst [1] : vector<16x128xf32> to vector<16xf32>
    %2 = vector.shape_cast %1 : vector<16xf32> to vector<16x1xf32>
    %cst_1 = arith.constant dense<0.000000e+00> : vector<16xf32>
    %3 = vector.multi_reduction <add>, %0, %cst_1 [1] : vector<16x128xf32> to vector<16xf32>
    %4 = vector.shape_cast %3 : vector<16xf32> to vector<16x1xf32>
    %cst_2 = arith.constant 7.812500e-03 : f32
    %5 = vector.broadcast %cst_2 : f32 to vector<16x1xf32>
    %6 = arith.mulf %4, %5 : vector<16x1xf32>
    %7 = vector.broadcast %2 : vector<16x1xf32> to vector<16x128xf32>
    %8 = arith.subf %0, %7 : vector<16x128xf32>
    %9 = math.exp %8 : vector<16x128xf32>
    %cst_3 = arith.constant dense<0.000000e+00> : vector<16xf32>
    %10 = vector.multi_reduction <add>, %9, %cst_3 [1] : vector<16x128xf32> to vector<16xf32>
    %11 = vector.shape_cast %10 : vector<16xf32> to vector<16x1xf32>
    %12 = arith.mulf %0, %9 : vector<16x128xf32>
    %cst_4 = arith.constant dense<0.000000e+00> : vector<16xf32>
    %13 = vector.multi_reduction <add>, %12, %cst_4 [1] : vector<16x128xf32> to vector<16xf32>
    %14 = vector.shape_cast %13 : vector<16xf32> to vector<16x1xf32>
    %15 = tpu.reciprocal %11 : vector<16x1xf32> -> vector<16x1xf32>
    %16 = arith.mulf %14, %15 : vector<16x1xf32>
    %17 = arith.subf %16, %6 : vector<16x1xf32>
    %c0_5 = arith.constant 0 : index
    %c0_6 = arith.constant 0 : index
    %18 = vector.load %arg2[%c0_5, %c0_6] : memref<16x1xf32, #tpu.memory_space<vmem>>, vector<16x1xf32>
    tpu.vector_store %arg2[%c0_5, %c0_6], %17 {strides = array<i32>} : memref<16x1xf32, #tpu.memory_space<vmem>>, vector<16x1xf32>,
    return
  }
  func.func @transform_0(%arg0: i32) -> (i32, i32) {
    %c0_i32 = arith.constant 0 : i32
    %c0_i32_0 = arith.constant 0 : i32
    return %arg0, %c0_i32 : i32, i32
  }
  func.func @transform_1(%arg0: i32) -> (i32, i32) {
    %c0_i32 = arith.constant 0 : i32
    %c0_i32_0 = arith.constant 0 : i32
    return %arg0, %c0_i32 : i32, i32
  }
}

</mosaic_0001>

<bundles_post_ra>
// kernel: tpu_custom_call.1
= control target key start
LH: loop header
LB: loop body
LE: loop exit
PB: predicated region body
PF: predicated region fallthrough
CT: control target
= control target key end

     0   :  { %6 = vsyncpa [#allocation3], 0  ;;  %s492_s0 = inlined_call_operand.hbm [shape: f32[32,128], index: 0, kind: input, shape index: {}]   ;;  %s493_s1 = inlined_call_operand.vmem [shape: f32[32,1], index: 1, kind: output, shape index: {}]  }
   0x1   :  { %8 = vsyncpa [#allocation3 + $0x1], 0  ;;  %s385_s6 = smov 0   ;;  %s387_s7 = smov 0  }
   0x2   :  { %s389_s8 = smov 0   ;;  %s391_s9 = smov 0  }
   0x3 LB: > { %s243_s10 = sadd.s32 4294967295, %s370_s9   ;;  %s405_s11 = sadd.s32 1, %s370_s9   ;;  %s370_s9 = sphi %s391_s9, %s500_s9   ;;  %s366_s8 = sphi %s389_s8, %s499_s8   ;;  %s362_s7 = sphi %s387_s7, %s498_s7   ;;  %s358_s6 = sphi %s385_s6, %s497_s6  }
   0x4   : > { %s18_s12 = ssub.s32 %s370_s9, %s405_s11  ;;  %s21_s13 = sadd.s32 1, %s366_s8 }
   0x5   : > { %p19_p0 = scmp.eq.s32.totalorder %s18_s12, 0  ;;  %p28_p1 = scmp.ne.s32.totalorder %s366_s8, %s362_s7 }
   0x6   : > { %p29_p2 = scmp.eq.s32.totalorder %s370_s9, 0  ;;  %p34_p3 = scmp.ne.s32.totalorder %s362_s7, %s358_s6 }
   0x7   : > { %s415_s14 = scalar_select %p19_p0, %s366_s8, %s21_s13  }
   0x8   : > { %p30_p4 = por %p29_p2, %p28_p1  ;;  %p35_p5 = scmp.eq.s32.totalorder %s243_s10, 0 }
   0x9   : > { %p263_p6 = scmp.lt.s32.totalorder %s370_s9, 2  ;;  %s84_s16 = sand.u32 1, %s366_s8  }
   0xa   : > { %p420_p7 = por %p35_p5, %p34_p3  ;;  %s247_s17 = sshll.u32 %s84_s16, 4 }
   0xb   : > { %s256_s18 = sshll.u32 %s370_s9, 8  ;;  %s88_s22 = scalar_lea.vmem [#allocation2], %s247_s17 }
   0xc   : > { %s429_s21 = scalar_lea.hbm %s492_s0, %s256_s18  ;;  %s95_s23 = sshll.u32 %s88_s22, 4  ;;  %s431_s23 = int_to_ptr.vmem [resolvable:$true] %s95_s23 }
   0xd   : > { %p433_p8 = pnand %p263_p6, %p30_p4  ;;  %s438_s25 = scalar_lea.sflag [#allocation3], %s84_s16 }
   0xe   : > { %s306_s26 = scalar_lea.hbm %s429_s21, 256  ;;  %s311_s29 = scalar_lea.hbm %s492_s0, 512 }
   0xf   : > { %p307_p10 = scmp.ne.s32.totalorder %s429_s21, %s306_s26  ;;  %p308_p11 = pneg %p433_p8 }
  0x10   : > { %p312_p0 = scmp.lt.u32.totalorder %s429_s21, %s492_s0  ;;  %p313_p1 = scmp.lt.u32.totalorder %s311_s29, %s306_s26 }
  0x11   : > { %p309_p12 = pnand %p308_p11, %p307_p10  ;;  %p315_p3 = scmp.lt.u32.totalorder %s306_s26, %s429_s21 }
  0x12   : > { %p314_p2 = por %p313_p1, %p312_p0 }
  0x13   : > { %p310_p13 = pneg %p309_p12 }
  0x14   : > { %p316_p4 = por %p315_p3, %p314_p2 }
  0x16   : > { %p317_p5 = pnand %p316_p4, %p310_p13 }
  0x18   : > { %320 = shalt.err (!%p317_p5)
}
  0x19   : > { %s321_s3 = scalar_lea.vmem %s431_s23, 256  ;;  %s372_s4 = smov [#allocation2]  }
  0x1a   : > { %p322_p6 = scmp.ne.s32.totalorder %s431_s23, %s321_s3  ;;  %s326_s5 = sshll.u32 %s372_s4, 4  ;;  %s327_s5 = int_to_ptr.vmem [resolvable:$false] %s326_s5 }
  0x1b   : > { %s328_s6 = scalar_lea.vmem %s327_s5, 512  ;;  %p329_p9 = scmp.lt.s32.totalorder %s431_s23, %s327_s5 }
  0x1c   : > { %p324_p10 = pnand %p322_p6, %p308_p11  ;;  %p330_p0 = scmp.lt.s32.totalorder %s328_s6, %s321_s3 }
  0x1e   : > { %p325_p12 = pneg %p324_p10  ;;  %p331_p1 = por %p330_p0, %p329_p9 }
  0x20   : > { %p332_p2 = pnand %p331_p1, %p325_p12 }
  0x22   : > { %335 = shalt.err (!%p332_p2)
}
  0x23   : > { %s373_s12 = smov 128   ;;  %s374_s13 = smov 8  }
  0x24   : > { %262 = dma.hbm_to_vmem [thread:$0]  (!%p433_p8), %s429_s21, 256, %s431_s23, %s438_s25, %s373_s12, %s373_s12, %s374_s13  }
  0x25   : > { %p103_p11 = scmp.lt.s32.totalorder %s370_s9, 3  ;;  %p496_p13 = scmp.ge.s32.totalorder %s370_s9, 1 }
  0x27   : > { %p104_p3 = pnand %p496_p13, %p103_p11 }
  0x28   : > { %s109_s16 = sand.u32 (!%p104_p3), 1, %s362_s7  }
  0x29   : > { %107 = sbr.rel (%p104_p3) target bundleno = 369 (0x171), region = 24  ;;  %s251_s17 = sshll.u32 (!%p104_p3), %s109_s16, 4 }
  0x2a   : > { %s110_s18 = scalar_lea.sflag (!%p104_p3), [#allocation3], %s109_s16  ;;  %s113_s19 = scalar_lea.vmem (!%p104_p3), [#allocation2], %s251_s17 }
  0x30   : > { %353 = dma.done.wait (%p420_p7), %s110_s18, 256  }
  0x31   : > { %355 = vsyncadd (%p420_p7), %s110_s18, 4294967040  ;;  %v139_v0 = vld [vmem:[%s113_s19] sm:$0xff]  ;;  %v140_v1 = vld [vmem:[%s113_s19 + $0x8] sm:$0xff]  ;;  %s252_s15 = sshll.u32 %s243_s10, 1  ;;  %vm173_vm0 = vcmask 7168  }
  0x32   : > { %141 = vmax.xlane.f32.xlu0 %v139_v0  ;;  %p134_p7 = scmp.lt.s32.totalorder %s252_s15, 3 }
  0x34   : > { %s502_s15 = smov (!%p134_p7, %s252_s15), 3 }
  0x35   : > { %s253_s20 = sshll.u32 %s502_s15, 3 }
  0x36   : > { %143 = vmax.xlane.f32.xlu0 %v140_v1  ;;  %s137_s23 = scalar_lea.vmem %s493_s1, %s253_s20 }
  0x3a   : > { %145 = vadd.xlane.f32.xlu0 %v139_v0 }
  0x3e   : > { %147 = vadd.xlane.f32.xlu0 %v140_v1 }
  0xbf   : > { %v142_v2 = vpop.xlane.xlu0 %141 }
  0xc0   : > { %v151_v3 = vsub.f32 %v139_v0, %v142_v2 }
  0xc2   : > { %v153_v4 = vmul.f32 1.442695, %v151_v3 }
  0xc3   : > { %v144_v5 = vpop.xlane.xlu0 %143 }
  0xc4   : > { %298 = vpow2.f32 %v153_v4  ;;  %v152_v6 = vsub.f32 %v140_v1, %v144_v5 }
  0xc6   : > { %v155_v7 = vmul.f32 1.442695, %v152_v6 }
  0xc7   : > { %v146_v14 = vpop.xlane.xlu0 %145 }
  0xc8   : > { %300 = vpow2.f32 %v155_v7  ;;  %v149_v16 = vmul.f32 0.0078125, %v146_v14 }
  0xcb   : > { %v148_v18 = vpop.xlane.xlu0 %147 }
  0xcc   : > { %v150_v21 = vmul.f32 0.0078125, %v148_v18 }
  0xce   : > { %v299_v8 = vpop.eup %298 }
  0xcf   : > { %157 = vadd.xlane.f32.xlu1 %v299_v8  ;;  %v161_v10 = vmul.f32 %v299_v8, %v139_v0 }
  0xd2   : > { %v301_v9 = vpop.eup %300 }
  0xd3   : > { %159 = vadd.xlane.f32.xlu1 %v301_v9  ;;  %v162_v11 = vmul.f32 %v301_v9, %v140_v1 }
  0xd7   : > { %163 = vadd.xlane.f32.xlu1 %v161_v10 }
  0xdb   : > { %165 = vadd.xlane.f32.xlu1 %v162_v11 }
 0x15c   : > { %v158_v12 = vpop.xlane.xlu1 %157 }
 0x15d   : > { %302 = vrcp.f32 %v158_v12 }
 0x160   : > { %v160_v13 = vpop.xlane.xlu1 %159 }
 0x161   : > { %304 = vrcp.f32 %v160_v13 }
 0x164   : > { %v164_v15 = vpop.xlane.xlu1 %163 }
 0x167   : > { %v303_v17 = vpop.eup %302 }
 0x168   : > { %v169_v19 = vmul.f32 %v303_v17, %v164_v15  ;;  %v166_v23 = vpop.xlane.xlu1 %165 }
 0x16a   : > { %v171_v20 = vsub.f32 %v169_v19, %v149_v16 }
 0x16b   : > { %v305_v22 = vpop.eup %304 }
 0x16c   : > { %174 = vst.msk [vmem:[%s137_s23] sm:$0xff] %vm173_vm0, %v171_v20  ;;  %v170_v24 = vmul.f32 %v305_v22, %v166_v23 }
 0x16e   : > { %v172_v25 = vsub.f32 %v170_v24, %v150_v21 }
 0x170   : > { %175 = vst.msk [vmem:[%s137_s23 + $0x8] sm:$0xff] %vm173_vm0, %v172_v25 }
 0x171 PF: > { %p11_p8 = scmp.ge.s32.totalorder %s405_s11, 4   ;;  %s497_s6 = smov %s362_s7 }
 0x172   : > { %s498_s7 = smov %s366_s8  ;;  %s499_s8 = smov %s415_s14 }
 0x173   : > { %s500_s9 = smov %s405_s11  ;;  %13 = sbr.rel (!%p11_p8) target bundleno = 3 (0x3), region = 64 }
 0x17a   :  { %198 = vsyncpa [#allocation3], 1 }
 0x17b   :  { %200 = vsyncpa [#allocation3 + $0x1], 1 }

</bundles_post_ra>
